<compile_context>
chip_gen: v5e
topology: v5e:2x2
jax: 0.10.0
libtpu: 0.0.40
codegen_flags: <defaults>
</compile_context>

<pallas_src>
import functools

import jax
import jax.numpy as jnp
from jax.experimental import pallas as pl
from jax.experimental.pallas import tpu as pltpu


KER = 3          # Conv1d kernel size (fixed to 3 in the PyTorch module)
PAD = 2          # ConstantPad1d((2, 0), 0): two zeros on the left of the sequence
NEG_SLOPE = 0.2  # LeakyReLU negative slope


def _shift_right(x, s):
    """y[:, t] = x[:, t - s], zero-filled for t < s (shift along the lane axis)."""
    if s == 0:
        return x
    c, length = x.shape
    zeros = jnp.zeros((c, s), dtype=x.dtype)
    return jnp.concatenate([zeros, x[:, :length - s]], axis=1)


def _fused_first_layer_kernel(x_ref, *rest, num_layers):
    """All conv layers fused; the activation stays resident between layers.

    x_ref : (1, C0, L)   one batch element; channels on sublanes, L on lanes
    rest  : (w_0, b_0, ..., w_{n-1}, b_{n-1}, o_ref)
       w_l : (KER, Cout_l, Cin_l)  tap-major weights
       b_l : (Cout_l, 1)           bias (broadcasts over L)
    o_ref : (1, C_last, L)
    """
    o_ref = rest[-1]
    x = x_ref[0].astype(jnp.float32)                       # (C0, L)

    for layer in range(num_layers):                        # unrolled (static)
        w_ref = rest[2 * layer]
        b_ref = rest[2 * layer + 1]
        # PyTorch Conv1d cross-correlation with a per-layer left pad of 2:
        #   out[co, t] = b[co] + sum_k W[co, :, k] . x[:, t + k - 2]
        acc = jnp.dot(w_ref[2], x, preferred_element_type=jnp.float32)
        acc = acc + jnp.dot(w_ref[1], _shift_right(x, 1),
                            preferred_element_type=jnp.float32)
        acc = acc + jnp.dot(w_ref[0], _shift_right(x, 2),
                            preferred_element_type=jnp.float32)
        acc = acc + b_ref[...]                             # (Cout, 1) -> (Cout, L)
        x = jnp.where(acc > 0, acc, NEG_SLOPE * acc)       # LeakyReLU(0.2)

    o_ref[0] = x.astype(o_ref.dtype)


def first_layer_forward(x_ncl, params):
    """Full first_layer forward.  x_ncl: (N, C, L) like PyTorch; returns (N, C_last, L)."""
    n, c0, seq_len = x_ncl.shape
    num_layers = len(params)
    c_last = params[-1][0].shape[0]

    # Pack kernel operands: activation + (weight, bias) per layer.
    kernel_args = [x_ncl]
    in_specs = [pl.BlockSpec((1, c0, seq_len), lambda i: (i, 0, 0))]
    for w, b in params:
        c_out, c_in, _ = w.shape
        # (Cout, Cin, KER) -> tap-major (KER, Cout, Cin); bias -> (Cout, 1).
        kernel_args.append(jnp.transpose(w, (2, 0, 1)).astype(jnp.float32))
        kernel_args.append(b.reshape(c_out, 1).astype(jnp.float32))
        in_specs.append(pl.BlockSpec((KER, c_out, c_in), lambda i: (0, 0, 0)))
        in_specs.append(pl.BlockSpec((c_out, 1), lambda i: (0, 0)))

    kernel = functools.partial(_fused_first_layer_kernel, num_layers=num_layers)

    return pl.pallas_call(
        kernel,
        out_shape=jax.ShapeDtypeStruct((n, c_last, seq_len), jnp.float32),
        grid_spec=pltpu.PrefetchScalarGridSpec(
            num_scalar_prefetch=0,
            grid=(n,),
            in_specs=in_specs,
            out_specs=pl.BlockSpec((1, c_last, seq_len), lambda i: (i, 0, 0)),
        ),
        compiler_params=pltpu.CompilerParams(
            dimension_semantics=("parallel",)),
    )(*kernel_args)


def init_first_layer_params(key, feature_size, num_convs):
    """Deterministic parameters mirroring the PyTorch module shapes."""
    params = []
    in_ch = feature_size
    for out_ch in num_convs:
        key, kw, kb = jax.random.split(key, 3)
        w = 0.1 * jax.random.normal(kw, (out_ch, in_ch, KER), dtype=jnp.float32)
        b = 0.1 * jax.random.normal(kb, (out_ch,), dtype=jnp.float32)
        params.append((w, b))
        in_ch = out_ch
    return params


def _reference_forward(x_ncl, params):
    """Pure-JAX reference for correctness check."""
    x = x_ncl
    for w, b in params:
        xp = jnp.pad(x, ((0, 0), (0, 0), (PAD, 0)))
        out = jax.lax.conv_general_dilated(
            xp, w, window_strides=(1,), padding="VALID",
            dimension_numbers=("NCH", "OIH", "NCH"))
        out = out + b[None, :, None]
        x = jnp.where(out > 0, out, NEG_SLOPE * out)
    return x


if __name__ == "__main__":
    key = jax.random.PRNGKey(0)
    k_x, k_p = jax.random.split(key)

    batch, feature_size, seq = 2, 4, 16
    num_convs = (8, 16)

    x = jax.random.normal(k_x, (batch, feature_size, seq), dtype=jnp.float32)
    params = init_first_layer_params(k_p, feature_size, num_convs)

    out = jax.block_until_ready(first_layer_forward(x, params))
    ref = jax.block_until_ready(_reference_forward(x, params))

    assert out.shape == (batch, num_convs[-1], seq), out.shape
    assert jnp.allclose(out, ref, atol=1e-5, rtol=1e-5), "mismatch vs reference"

    print("KERNEL_OK")
</pallas_src>

<mosaic_0001>
module attributes {stable_mosaic.version = 11 : i64} {
  func.func @_fused_first_layer_kernel(%arg0: i32, %arg1: memref<1x4x16xf32, #tpu.memory_space<vmem>>, %arg2: memref<3x8x4xf32, #tpu.memory_space<vmem>>, %arg3: memref<8x1xf32, #tpu.memory_space<vmem>>, %arg4: memref<3x16x8xf32, #tpu.memory_space<vmem>>, %arg5: memref<16x1xf32, #tpu.memory_space<vmem>>, %arg6: memref<1x16x16xf32, #tpu.memory_space<vmem>>) attributes {dimension_semantics = [#tpu.dimension_semantics<parallel>], iteration_bounds = array<i64: 2>, scalar_prefetch = 0 : i64, scratch_operands = 0 : i64, tpu.core_type = #tpu.core_type<tc>, window_params = [{transform_indices = @transform_0, window_bounds = array<i64: 1, 4, 16>}, {pipeline_mode = #tpu.pipeline_mode<synchronous>, transform_indices = @transform_1, window_bounds = array<i64: 3, 8, 4>}, {pipeline_mode = #tpu.pipeline_mode<synchronous>, transform_indices = @transform_2, window_bounds = array<i64: 8, 1>}, {pipeline_mode = #tpu.pipeline_mode<synchronous>, transform_indices = @transform_3, window_bounds = array<i64: 3, 16, 8>}, {pipeline_mode = #tpu.pipeline_mode<synchronous>, transform_indices = @transform_4, window_bounds = array<i64: 16, 1>}, {transform_indices = @transform_5, window_bounds = array<i64: 1, 16, 16>}]} {
    %c0 = arith.constant 0 : index
    %c0_0 = arith.constant 0 : index
    %c0_1 = arith.constant 0 : index
    %0 = vector.load %arg1[%c0, %c0_0, %c0_1] : memref<1x4x16xf32, #tpu.memory_space<vmem>>, vector<1x4x16xf32>
    %1 = vector.shape_cast %0 : vector<1x4x16xf32> to vector<4x16xf32>
    %c2 = arith.constant 2 : index
    %c0_2 = arith.constant 0 : index
    %c0_3 = arith.constant 0 : index
    %2 = vector.load %arg2[%c2, %c0_2, %c0_3] : memref<3x8x4xf32, #tpu.memory_space<vmem>>, vector<1x8x4xf32>
    %3 = vector.shape_cast %2 : vector<1x8x4xf32> to vector<8x4xf32>
    %cst = arith.constant dense<0.000000e+00> : vector<8x16xf32>
    %4 = tpu.matmul %3, %1, %cst {dimension_numbers = #tpu.dot_dimension_numbers<[1], [0], [0], [1], [0, 0, 1, 1], [], []>} : vector<8x4xf32>, vector<4x16xf32>, vector<8x16xf32> -> vector<8x16xf32>
    %c1 = arith.constant 1 : index
    %c0_4 = arith.constant 0 : index
    %c0_5 = arith.constant 0 : index
    %5 = vector.load %arg2[%c1, %c0_4, %c0_5] : memref<3x8x4xf32, #tpu.memory_space<vmem>>, vector<1x8x4xf32>
    %6 = vector.shape_cast %5 : vector<1x8x4xf32> to vector<8x4xf32>
    %cst_6 = arith.constant 0.000000e+00 : f32
    %7 = vector.broadcast %cst_6 : f32 to vector<4x1xf32>
    %8 = vector.extract_strided_slice %1 {offsets = [0, 0], sizes = [4, 15], strides = [1, 1]} : vector<4x16xf32> to vector<4x15xf32>
    %9 = tpu.concatenate %7, %8 in 1 : vector<4x1xf32>, vector<4x15xf32> -> vector<4x16xf32>
    %cst_7 = arith.constant dense<0.000000e+00> : vector<8x16xf32>
    %10 = tpu.matmul %6, %9, %cst_7 {dimension_numbers = #tpu.dot_dimension_numbers<[1], [0], [0], [1], [0, 0, 1, 1], [], []>} : vector<8x4xf32>, vector<4x16xf32>, vector<8x16xf32> -> vector<8x16xf32>
    %11 = arith.addf %4, %10 : vector<8x16xf32>
    %c0_8 = arith.constant 0 : index
    %c0_9 = arith.constant 0 : index
    %c0_10 = arith.constant 0 : index
    %12 = vector.load %arg2[%c0_8, %c0_9, %c0_10] : memref<3x8x4xf32, #tpu.memory_space<vmem>>, vector<1x8x4xf32>
    %13 = vector.shape_cast %12 : vector<1x8x4xf32> to vector<8x4xf32>
    %cst_11 = arith.constant 0.000000e+00 : f32
    %14 = vector.broadcast %cst_11 : f32 to vector<4x2xf32>
    %15 = vector.extract_strided_slice %1 {offsets = [0, 0], sizes = [4, 14], strides = [1, 1]} : vector<4x16xf32> to vector<4x14xf32>
    %16 = tpu.concatenate %14, %15 in 1 : vector<4x2xf32>, vector<4x14xf32> -> vector<4x16xf32>
    %cst_12 = arith.constant dense<0.000000e+00> : vector<8x16xf32>
    %17 = tpu.matmul %13, %16, %cst_12 {dimension_numbers = #tpu.dot_dimension_numbers<[1], [0], [0], [1], [0, 0, 1, 1], [], []>} : vector<8x4xf32>, vector<4x16xf32>, vector<8x16xf32> -> vector<8x16xf32>
    %18 = arith.addf %11, %17 : vector<8x16xf32>
    %c0_13 = arith.constant 0 : index
    %c0_14 = arith.constant 0 : index
    %19 = vector.load %arg3[%c0_13, %c0_14] : memref<8x1xf32, #tpu.memory_space<vmem>>, vector<8x1xf32>
    %20 = vector.broadcast %19 : vector<8x1xf32> to vector<8x16xf32>
    %21 = arith.addf %18, %20 : vector<8x16xf32>
    %cst_15 = arith.constant 0.000000e+00 : f32
    %22 = vector.broadcast %cst_15 : f32 to vector<8x16xf32>
    %23 = arith.cmpf ogt, %21, %22 : vector<8x16xf32>
    %cst_16 = arith.constant 2.000000e-01 : f32
    %24 = vector.broadcast %cst_16 : f32 to vector<8x16xf32>
    %25 = arith.mulf %24, %21 : vector<8x16xf32>
    %26 = arith.select %23, %21, %25 : vector<8x16xi1>, vector<8x16xf32>
    %c2_17 = arith.constant 2 : index
    %c0_18 = arith.constant 0 : index
    %c0_19 = arith.constant 0 : index
    %27 = vector.load %arg4[%c2_17, %c0_18, %c0_19] : memref<3x16x8xf32, #tpu.memory_space<vmem>>, vector<1x16x8xf32>
    %28 = vector.shape_cast %27 : vector<1x16x8xf32> to vector<16x8xf32>
    %cst_20 = arith.constant dense<0.000000e+00> : vector<16x16xf32>
    %29 = tpu.matmul %28, %26, %cst_20 {dimension_numbers = #tpu.dot_dimension_numbers<[1], [0], [0], [1], [0, 0, 1, 1], [], []>} : vector<16x8xf32>, vector<8x16xf32>, vector<16x16xf32> -> vector<16x16xf32>
    %c1_21 = arith.constant 1 : index
    %c0_22 = arith.constant 0 : index
    %c0_23 = arith.constant 0 : index
    %30 = vector.load %arg4[%c1_21, %c0_22, %c0_23] : memref<3x16x8xf32, #tpu.memory_space<vmem>>, vector<1x16x8xf32>
    %31 = vector.shape_cast %30 : vector<1x16x8xf32> to vector<16x8xf32>
    %cst_24 = arith.constant 0.000000e+00 : f32
    %32 = vector.broadcast %cst_24 : f32 to vector<8x1xf32>
    %33 = vector.extract_strided_slice %26 {offsets = [0, 0], sizes = [8, 15], strides = [1, 1]} : vector<8x16xf32> to vector<8x15xf32>
    %34 = tpu.concatenate %32, %33 in 1 : vector<8x1xf32>, vector<8x15xf32> -> vector<8x16xf32>
    %cst_25 = arith.constant dense<0.000000e+00> : vector<16x16xf32>
    %35 = tpu.matmul %31, %34, %cst_25 {dimension_numbers = #tpu.dot_dimension_numbers<[1], [0], [0], [1], [0, 0, 1, 1], [], []>} : vector<16x8xf32>, vector<8x16xf32>, vector<16x16xf32> -> vector<16x16xf32>
    %36 = arith.addf %29, %35 : vector<16x16xf32>
    %c0_26 = arith.constant 0 : index
    %c0_27 = arith.constant 0 : index
    %c0_28 = arith.constant 0 : index
    %37 = vector.load %arg4[%c0_26, %c0_27, %c0_28] : memref<3x16x8xf32, #tpu.memory_space<vmem>>, vector<1x16x8xf32>
    %38 = vector.shape_cast %37 : vector<1x16x8xf32> to vector<16x8xf32>
    %cst_29 = arith.constant 0.000000e+00 : f32
    %39 = vector.broadcast %cst_29 : f32 to vector<8x2xf32>
    %40 = vector.extract_strided_slice %26 {offsets = [0, 0], sizes = [8, 14], strides = [1, 1]} : vector<8x16xf32> to vector<8x14xf32>
    %41 = tpu.concatenate %39, %40 in 1 : vector<8x2xf32>, vector<8x14xf32> -> vector<8x16xf32>
    %cst_30 = arith.constant dense<0.000000e+00> : vector<16x16xf32>
    %42 = tpu.matmul %38, %41, %cst_30 {dimension_numbers = #tpu.dot_dimension_numbers<[1], [0], [0], [1], [0, 0, 1, 1], [], []>} : vector<16x8xf32>, vector<8x16xf32>, vector<16x16xf32> -> vector<16x16xf32>
    %43 = arith.addf %36, %42 : vector<16x16xf32>
    %c0_31 = arith.constant 0 : index
    %c0_32 = arith.constant 0 : index
    %44 = vector.load %arg5[%c0_31, %c0_32] : memref<16x1xf32, #tpu.memory_space<vmem>>, vector<16x1xf32>
    %45 = vector.broadcast %44 : vector<16x1xf32> to vector<16x16xf32>
    %46 = arith.addf %43, %45 : vector<16x16xf32>
    %cst_33 = arith.constant 0.000000e+00 : f32
    %47 = vector.broadcast %cst_33 : f32 to vector<16x16xf32>
    %48 = arith.cmpf ogt, %46, %47 : vector<16x16xf32>
    %cst_34 = arith.constant 2.000000e-01 : f32
    %49 = vector.broadcast %cst_34 : f32 to vector<16x16xf32>
    %50 = arith.mulf %49, %46 : vector<16x16xf32>
    %51 = arith.select %48, %46, %50 : vector<16x16xi1>, vector<16x16xf32>
    %c0_35 = arith.constant 0 : index
    %c0_36 = arith.constant 0 : index
    %c0_37 = arith.constant 0 : index
    %52 = vector.load %arg6[%c0_35, %c0_36, %c0_37] : memref<1x16x16xf32, #tpu.memory_space<vmem>>, vector<1x16x16xf32>
    %53 = vector.shape_cast %52 : vector<1x16x16xf32> to vector<16x16xf32>
    %54 = vector.shape_cast %51 : vector<16x16xf32> to vector<1x16x16xf32>
    tpu.vector_store %arg6[%c0_35, %c0_36, %c0_37], %54 {strides = array<i32>} : memref<1x16x16xf32, #tpu.memory_space<vmem>>, vector<1x16x16xf32>,
    return
  }
  func.func @transform_0(%arg0: i32) -> (i32, i32, i32) {
    %c0_i32 = arith.constant 0 : i32
    %c0_i32_0 = arith.constant 0 : i32
    %c0_i32_1 = arith.constant 0 : i32
    return %arg0, %c0_i32, %c0_i32_0 : i32, i32, i32
  }
  func.func @transform_1(%arg0: i32) -> (i32, i32, i32) {
    %c0_i32 = arith.constant 0 : i32
    %c0_i32_0 = arith.constant 0 : i32
    %c0_i32_1 = arith.constant 0 : i32
    %c0_i32_2 = arith.constant 0 : i32
    return %c0_i32, %c0_i32_0, %c0_i32_1 : i32, i32, i32
  }
  func.func @transform_2(%arg0: i32) -> (i32, i32) {
    %c0_i32 = arith.constant 0 : i32
    %c0_i32_0 = arith.constant 0 : i32
    %c0_i32_1 = arith.constant 0 : i32
    return %c0_i32, %c0_i32_0 : i32, i32
  }
  func.func @transform_3(%arg0: i32) -> (i32, i32, i32) {
    %c0_i32 = arith.constant 0 : i32
    %c0_i32_0 = arith.constant 0 : i32
    %c0_i32_1 = arith.constant 0 : i32
    %c0_i32_2 = arith.constant 0 : i32
    return %c0_i32, %c0_i32_0, %c0_i32_1 : i32, i32, i32
  }
  func.func @transform_4(%arg0: i32) -> (i32, i32) {
    %c0_i32 = arith.constant 0 : i32
    %c0_i32_0 = arith.constant 0 : i32
    %c0_i32_1 = arith.constant 0 : i32
    return %c0_i32, %c0_i32_0 : i32, i32
  }
  func.func @transform_5(%arg0: i32) -> (i32, i32, i32) {
    %c0_i32 = arith.constant 0 : i32
    %c0_i32_0 = arith.constant 0 : i32
    %c0_i32_1 = arith.constant 0 : i32
    return %arg0, %c0_i32, %c0_i32_0 : i32, i32, i32
  }
}

</mosaic_0001>

<bundles_post_ra>
// kernel: tpu_custom_call.1
= control target key start
LH: loop header
LB: loop body
LE: loop exit
PB: predicated region body
PF: predicated region fallthrough
CT: control target
= control target key end

     0   :  { %10 = vsyncpa [#allocation3], 0  ;;  %s858_s0 = inlined_call_operand.vmem [shape: f32[2,4,16], index: 0, kind: input, shape index: {}]   ;;  %s859_s1 = inlined_call_operand.vmem [shape: f32[3,8,4], index: 1, kind: input, shape index: {}]   ;;  %s860_s2 = inlined_call_operand.vmem [shape: f32[8,1], index: 2, kind: input, shape index: {}]   ;;  %s861_s3 = inlined_call_operand.vmem [shape: f32[3,16,8], index: 3, kind: input, shape index: {}]   ;;  %s862_s4 = inlined_call_operand.vmem [shape: f32[16,1], index: 4, kind: input, shape index: {}]   ;;  %s863_s5 = inlined_call_operand.hbm [shape: f32[2,16,16], index: 5, kind: output, shape index: {}]  }
   0x1   :  { %12 = vsyncpa [#allocation3 + $0x1], 0  ;;  %s715_s18 = smov 0   ;;  %s717_s19 = smov 0  }
   0x2   :  { %s719_s20 = smov 0   ;;  %s721_s21 = smov 0  }
   0x3 LB: > { %s736_s22 = sadd.s32 4294967295, %s678_s21   ;;  %s535_s23 = sadd.s32 4294967294, %s678_s21   ;;  %s678_s21 = sphi %s721_s21, %s869_s21   ;;  %s674_s20 = sphi %s719_s20, %s868_s20   ;;  %s670_s19 = sphi %s717_s19, %s867_s19   ;;  %s666_s18 = sphi %s715_s18, %s866_s18  }
   0x4   : > { %s740_s24 = sadd.s32 1, %s678_s21   ;;  %s135_s25 = sadd.s32 1, %s674_s20 }
   0x5   : > { %s132_s26 = ssub.s32 %s678_s21, %s740_s24  ;;  %p145_p0 = scmp.ne.s32.totalorder %s674_s20, %s670_s19 }
   0x6   : > { %p133_p1 = scmp.eq.s32.totalorder %s132_s26, 0  ;;  %p146_p2 = scmp.eq.s32.totalorder %s736_s22, 1 }
   0x7   : > { %p151_p3 = scmp.ne.s32.totalorder %s670_s19, %s666_s18  ;;  %p152_p4 = scmp.eq.s32.totalorder %s535_s23, 1 }
   0x8   : > { %s751_s27 = scalar_select %p133_p1, %s674_s20, %s135_s25  }
   0x9   : > { %p753_p5 = por %p146_p2, %p145_p0  ;;  %p757_p6 = por %p152_p4, %p151_p3 }
   0xa   : > { %p538_p7 = scmp.ge.s32.totalorder %s678_s21, 1  ;;  %p189_p8 = scmp.lt.s32.totalorder %s678_s21, 3 }
   0xc   : > { %p190_p9 = pnand %p538_p7, %p189_p8 }
   0xd   : > { %p216_p10 = scmp.lt.s32.totalorder (!%p190_p9), %s736_s22, 1  ;;  %s680_s10 = smov (!%p190_p9), 1  }
   0xe   : > { %193 = sbr.rel (%p190_p9) target bundleno = 557 (0x22d), region = 40  ;;  %s681_s11 = smov (!%p190_p9), 2  }
   0xf   : > { %s213_s26 = sand.u32 (!%p190_p9), 1, %s670_s19   ;;  %s636_s17 = scalar_lea.hbm (!%p190_p9), %s863_s5, 32 }
  0x13   : > { %s217_s30 = scalar_select %p216_p10, %s736_s22, 1  ;;  %vm235_vm0 = vcmask 1043456   ;;  %vm231_vm1 = vcmask 31744   ;;  %v541_v1 = vld [vmem:[%s859_s1 + $0x10] sm:$0xff]  ;;  %v317_v2 = vld [vmem:[%s860_s2] sm:$0xff]  ;;  %v682_v3 = vmov 0  }
  0x14   : > { %613 = vset.pattern.permute.xlu1 %v682_v3  ;;  %615 = vset.pattern.permute.xlu0 %v682_v3  ;;  %vm229_vm2 = vcmask 7168   ;;  %v542_v5 = vld [vmem:[%s859_s1 + $0x8] sm:$0xff]  ;;  %vm288_vm3 = vcmask 15360   ;;  %v284_v8 = vld [vmem:[%s859_s1] sm:$0xff]  ;;  %vm338_vm5 = vcmask 64512   ;;  %v551_v26 = vld [vmem:[%s861_s3 + $0x10] sm:$0xff] }
  0x15   : > { %s540_s6 = sshll.u32 %s217_s30, 2  ;;  %320 = vperm.xlu1 %613, %v317_v2   ;;  %614 = vset.pattern.permute.xlu2 %v682_v3  ;;  %v549_v19 = vld [vmem:[%s861_s3 + $0x20] sm:$0xff]  ;;  %vm559_vm6 = vmneg %vm288_vm3  ;;  %v550_v22 = vld [vmem:[%s861_s3 + $0x28] sm:$0xff]  ;;  %s539_s30 = sshll.u32 %s213_s26, 4  ;;  %vm454_vm8 = vcmask 130048  }
  0x16   : > { %s219_s9 = scalar_lea.vmem %s858_s0, %s540_s6  ;;  %v397_v21 = vld [vmem:[%s861_s3] sm:$0xff]  ;;  %v435_v23 = vld [vmem:[%s862_s4 + $0x8] sm:$0xff]  ;;  %vm553_vm7 = vmneg %vm229_vm2  ;;  %s568_s6 = sshll.u32 %s736_s22, 4 }
  0x17   : > { %v220_v0 = vld [vmem:[%s219_s9] sm:$0xf]  ;;  %v398_v25 = vld [vmem:[%s861_s3 + $0x8] sm:$0xff]  ;;  %v552_v28 = vld [vmem:[%s861_s3 + $0x18] sm:$0xff]  ;;  %s215_s7 = scalar_lea.vmem [#allocation2], %s539_s30  ;;  %s458_s22 = scalar_lea.sflag [#allocation3], %s213_s26 }
  0x18   : > { %226 = vrot.lane.b32.xlu0 %v220_v0, %s680_s10  ;;  %545 = vmatpush.msk.msra.mxu1 %vm235_vm0, %v220_v0  ;;  %v434_v24 = vld [vmem:[%s862_s4] sm:$0xff] }
  0x19   : > { %546 = vmatmul.msk.f32.vlgmr.msra.gmra.mxu1 %vm231_vm1, %v541_v1 }
  0x20   : > { %285 = vrot.lane.b32.xlu0 %v220_v0, %s681_s11 }
  0x28   : > { %443 = vperm.xlu0 %615, %v435_v23  }
  0x87   : > { %v321_v14 = vpop.permute.xlu1 %320 }
  0x8a   : > { %v227_v4 = vpop.permute.xlu0 %226 }
  0x8b   : > { %v230_v6 = vsel %vm229_vm2, 0.0, %v227_v4 }
  0x8c   : > { %543 = vmatpush.msk.msra.mxu2 %vm235_vm0, %v230_v6 }
  0x8d   : > { %544 = vmatmul.msk.f32.vlgmr.msra.gmra.mxu2 %vm231_vm1, %v542_v5 }
  0x92   : > { %v286_v7 = vpop.permute.xlu0 %285 }
  0x93   : > { %v289_v9 = vsel %vm288_vm3, 0.0, %v286_v7 }
  0x94   : > { %547 = vmatpush.msk.msrb.mxu2 %vm235_vm0, %v289_v9 }
  0x95   : > { %548 = vmatmul.msk.f32.vlgmr.msrb.gmra.mxu2 %vm231_vm1, %v284_v8 }
  0x96   : > { %v281_v11 = vpop.f32.mrf.mxu1 }
  0x9a   : > { %v444_v42 = vpop.permute.xlu0 %443 }
 0x110   : > { %v256_v10 = vpop.f32.mrf.mxu2 }
 0x111   : > { %v282_v12 = vadd.f32 %v281_v11, %v256_v10 }
 0x118   : > { %v313_v13 = vpop.f32.mrf.mxu2 }
 0x119   : > { %v316_v15 = vadd.f32 %v313_v13, %v282_v12 }
 0x11b   : > { %v323_v16 = vadd.f32 %v321_v14, %v316_v15 }
 0x11d   : > { %v325_v17 = vmul.f32 0.2, %v323_v16  ;;  %vm324_vm4 = vcmp.gt.f32.partialorder %v323_v16, 0.0 }
 0x11f   : > { %v326_v18 = vsel %vm324_vm4, %v323_v16, %v325_v17 }
 0x120   : > { %399 = vrot.lane.b32.xlu2 %v326_v18, %s681_s11  ;;  %334 = vrot.lane.b32.xlu1 %v326_v18, %s680_s10  ;;  %s469_s10 = scalar_lea.hbm %s863_s5, %s568_s6  ;;  %s470_s11 = sshll.u32 %s215_s7, 4  ;;  %s471_s11 = int_to_ptr.vmem [resolvable:$true] %s470_s11 }
 0x121   : > { %389 = vmatpush.msra.mxu0 %v326_v18  ;;  %s472_s12 = sshll.u32 %s469_s10, 4  ;;  %s473_s12 = int_to_ptr.hbm [resolvable:$true] %s472_s12 }
 0x122   : > { %557 = vmatmul.msk.f32.vlgmr.msra.gmra.mxu0 %vm338_vm5, %v549_v19  ;;  %s630_s13 = sshra.s32 %s473_s12, 4  ;;  %s631_s13 = int_to_ptr.hbm [resolvable:$true] %s630_s13 }
 0x123   : > { %s632_s14 = scalar_lea.hbm %s631_s13, 16  ;;  %p637_p0 = scmp.lt.s32.totalorder %s631_s13, %s863_s5 }
 0x124   : > { %p633_p11 = scmp.ne.s32.totalorder %s631_s13, %s632_s14  ;;  %p638_p1 = scmp.lt.s32.totalorder %s636_s17, %s632_s14 }
 0x126   : > { %p634_p12 = pnand %p633_p11, %p753_p5  ;;  %p639_p2 = por %p638_p1, %p637_p0 }
 0x128   : > { %438 = vperm.xlu2 %614, %v434_v24   ;;  %p635_p13 = pneg %p634_p12 }
 0x12a   : > { %558 = vmatmul.msk.f32.gmra.mxu0 %vm338_vm5, %v550_v22  ;;  %p640_p3 = pnand %p639_p2, %p635_p13 }
 0x17a   : > { %v400_v20 = vpop.permute.xlu2 %399 }
 0x17b   : > { %560 = vmatpush.msk.msrb.mxu1 %vm559_vm6, %v400_v20 }
 0x17c   : > { %561 = vmatmul.msk.f32.vlgmr.msrb.gmra.mxu1 %vm338_vm5, %v397_v21 }
 0x182   : > { %v439_v33 = vpop.permute.xlu2 %438 }
 0x184   : > { %562 = vmatmul.msk.f32.gmra.mxu1 %vm338_vm5, %v398_v25 }
 0x192   : > { %v335_v27 = vpop.permute.xlu1 %334 }
 0x193   : > { %554 = vmatpush.msk.msra.mxu3 %vm553_vm7, %v335_v27 }
 0x194   : > { %555 = vmatmul.msk.f32.vlgmr.msra.gmra.mxu3 %vm338_vm5, %v551_v26 }
 0x19c   : > { %556 = vmatmul.msk.f32.gmra.mxu3 %vm338_vm5, %v552_v28 }
 0x19f   : > { %v391_v29 = vpop.f32.mrf.mxu0 }
 0x1a7   : > { %v394_v36 = vpop.f32.mrf.mxu0 }
 0x1f9   : > { %v426_v30 = vpop.f32.mrf.mxu1 }
 0x201   : > { %v429_v39 = vpop.f32.mrf.mxu1 }
 0x217   : > { %v362_v31 = vpop.f32.mrf.mxu3 }
 0x218   : > { %v392_v32 = vadd.f32 %v391_v29, %v362_v31 }
 0x21a   : > { %v432_v34 = vadd.f32 %v426_v30, %v392_v32 }
 0x21c   : > { %v446_v35 = vadd.f32 %v439_v33, %v432_v34 }
 0x21e   : > { %vm448_vm9 = vcmp.gt.f32.partialorder %v446_v35, 0.0  ;;  %v450_v37 = vmul.f32 0.2, %v446_v35 }
 0x21f   : > { %v365_v38 = vpop.f32.mrf.mxu3 }
 0x220   : > { %v452_v40 = vsel %vm448_vm9, %v446_v35, %v450_v37  ;;  %v395_v41 = vadd.f32 %v394_v36, %v365_v38 }
 0x221   : > { %455 = vst.msk [vmem:[%s215_s7] sm:$0xff] %vm454_vm8, %v452_v40 }
 0x222   : > { %v433_v43 = vadd.f32 %v429_v39, %v395_v41 }
 0x224   : > { %v447_v44 = vadd.f32 %v444_v42, %v433_v43 }
 0x226   : > { %vm449_vm10 = vcmp.gt.f32.partialorder %v447_v44, 0.0  ;;  %v451_v45 = vmul.f32 0.2, %v447_v44 }
 0x228   : > { %v453_v46 = vsel %vm449_vm10, %v447_v44, %v451_v45 }
 0x229   : > { %456 = vst.msk [vmem:[%s215_s7 + $0x8] sm:$0xff] %vm454_vm8, %v453_v46 }
 0x22a   : > { %643 = shalt.err (!%p640_p3)
}
 0x22b   : > { %s683_s26 = smov 128   ;;  %s684_s30 = smov 8  }
 0x22c   : > { %569 = dma.vmem_to_hbm [thread:$0]  (%p753_p5), %s471_s11, 256, %s473_s12, %s458_s22, %s683_s26, %s683_s26, %s684_s30  }
 0x22d PF: > { %p575_p4 = scmp.ge.s32.totalorder %s678_s21, 2  ;;  %s487_s6 = sand.u32 1, %s666_s18  }
 0x22e   : > { %s488_s7 = scalar_lea.sflag [#allocation3], %s487_s6 }
 0x22f   : > { %p572_p7 = pnand %p575_p4, %p757_p6 }
 0x231   : > { %p573_p8 = pneg %p572_p7 }
 0x233   : > { %661 = dma.done.wait (%p573_p8), %s488_s7, 256  }
 0x234   : > { %663 = vsyncadd (%p573_p8), %s488_s7, 4294967040  ;;  %p15_p9 = scmp.ge.s32.totalorder %s740_s24, 4   ;;  %s866_s18 = smov %s670_s19 }
 0x235   : > { %s867_s19 = smov %s674_s20  ;;  %s868_s20 = smov %s751_s27 }
 0x236   : > { %s869_s21 = smov %s740_s24  ;;  %17 = sbr.rel (!%p15_p9) target bundleno = 3 (0x3), region = 79 }
 0x23b   :  { %494 = vsyncpa [#allocation3], 1 }
 0x23c   :  { %496 = vsyncpa [#allocation3 + $0x1], 1 }

</bundles_post_ra>
